<compile_context>
chip_gen: v7x
topology: tpu7x:2x2x1
jax: 0.10.0
libtpu: 0.0.40
codegen_flags: <defaults>
</compile_context>

<pallas_src>
import functools
import math

import jax
import jax.numpy as jnp
from jax import lax
from jax.experimental import pallas as pl
from jax.experimental.pallas import tpu as pltpu


# ----------------------------- helpers ------------------------------------

def _round_up(x, m):
    return ((x + m - 1) // m) * m


def _pick_seq_tile(s, max_tile):
    """Largest multiple-of-8 tile (<= max_tile) that divides s, else s itself."""
    for c in (max_tile, 512, 256, 128, 64, 32, 16, 8):
        if c <= max_tile and s % c == 0:
            return c
    return s


def _pick_lane_tile(n):
    """n is always a multiple of 128 here."""
    for c in (512, 256, 128):
        if n % c == 0:
            return c
    return n


# --------------------------- KV projection kernel --------------------------

def _linear_kernel(x_ref, w_ref, b_ref, o_ref):
    # x_ref: (tile_m, K), w_ref: (K, tile_n), b_ref: (1, tile_n)
    acc = jnp.dot(x_ref[...], w_ref[...], preferred_element_type=jnp.float32)
    o_ref[...] = (acc + b_ref[...].astype(jnp.float32)).astype(o_ref.dtype)


def _linear(x2d, w_t, b2d):
    """y = x2d @ w_t + b2d, row-tiled (batch folded into M) and N-tiled."""
    M, K = x2d.shape
    N = w_t.shape[1]

    tile_m = min(256, _round_up(M, 8))
    Mp = _round_up(M, tile_m)
    if Mp != M:
        x2d = jnp.pad(x2d, ((0, Mp - M), (0, 0)))
    tile_n = _pick_lane_tile(N)

    itemsize = jnp.dtype(x2d.dtype).itemsize
    out = pl.pallas_call(
        _linear_kernel,
        out_shape=jax.ShapeDtypeStruct((Mp, N), x2d.dtype),
        grid_spec=pltpu.PrefetchScalarGridSpec(
            num_scalar_prefetch=0,
            grid=(Mp // tile_m, N // tile_n),
            in_specs=[
                pl.BlockSpec((tile_m, K), lambda i, j: (i, 0)),   # activations
                pl.BlockSpec((K, tile_n), lambda i, j: (0, j)),   # weights (const over i)
                pl.BlockSpec((1, tile_n), lambda i, j: (0, j)),   # bias
            ],
            out_specs=pl.BlockSpec((tile_m, tile_n), lambda i, j: (i, j)),
        ),
        compiler_params=pltpu.CompilerParams(
            dimension_semantics=("parallel", "parallel"),
            vmem_limit_bytes=48 * 1024 * 1024),
        cost_estimate=pl.CostEstimate(
            flops=2 * Mp * K * N,
            transcendentals=0,
            bytes_accessed=(Mp * K + K * N + Mp * N) * itemsize),
    )(x2d, w_t, b2d)
    return out[:M] if Mp != M else out


# ------------------- fused Q-projection + flash attention ------------------

def _fused_qproj_flash_kernel(x_ref, wq_ref, bq_ref, kv_ref, o_ref,
                              q_sc, m_sc, l_sc, acc_sc, *, inv_scale, ep):
    # x_ref:  (1, tile_q, Ep)   q-side activations
    # wq_ref: (Ep, Ep)          Q projection weight (resident, const block idx)
    # bq_ref: (1, Ep)           Q projection bias
    # kv_ref: (1, tile_k, 2Ep)  fused [K | V] tile for this kv step
    # o_ref:  (1, tile_q, Ep)
    kk = pl.program_id(2)

    @pl.when(kk == 0)
    def _():
        # Q projection fused in: computed once per (batch, q-tile), kept in VMEM.
        # The softmax scale is folded into Q here (cheaper than scaling scores).
        q = jnp.dot(x_ref[0], wq_ref[...], preferred_element_type=jnp.float32)
        q = (q + bq_ref[...].astype(jnp.float32)) * inv_scale
        q_sc[...] = q.astype(q_sc.dtype)
        m_sc[...] = jnp.full_like(m_sc, -jnp.inf)
        l_sc[...] = jnp.zeros_like(l_sc)
        acc_sc[...] = jnp.zeros_like(acc_sc)

    # Slice K / V directly out of the ref (lane-aligned: ep is a multiple of 128).
    k = kv_ref[0, :, :ep]                    # (tile_k, Ep)
    v = kv_ref[0, :, ep:]                    # (tile_k, Ep)

    # scores without an explicit transpose: contract the last dims of q and k.
    s = lax.dot_general(q_sc[...], k, (((1,), (1,)), ((), ())),
                        preferred_element_type=jnp.float32)

    m_prev = m_sc[...]
    m_new = jnp.maximum(m_prev, jnp.max(s, axis=-1, keepdims=True))
    alpha = jnp.exp(m_prev - m_new)
    p = jnp.exp(s - m_new)
    l_sc[...] = alpha * l_sc[...] + jnp.sum(p, axis=-1, keepdims=True)
    acc_sc[...] = alpha * acc_sc[...] + jnp.dot(
        p.astype(v.dtype), v, preferred_element_type=jnp.float32)
    m_sc[...] = m_new

    @pl.when(kk == pl.num_programs(2) - 1)
    def _():
        o_ref[0] = (acc_sc[...] *
                    pl.reciprocal(l_sc[...], approx=True)).astype(o_ref.dtype)


def _fused_attention(x_p, kv, wq_t, bq_p, inv_scale):
    B, Sq, Ep = x_p.shape
    _, Sk, two_ep = kv.shape
    assert two_ep == 2 * Ep

    tile_q = _pick_seq_tile(Sq, 256)
    tile_k = _pick_seq_tile(Sk, 512)
    nq, nk = Sq // tile_q, Sk // tile_k

    itemsize = jnp.dtype(x_p.dtype).itemsize
    kernel = functools.partial(_fused_qproj_flash_kernel,
                               inv_scale=inv_scale, ep=Ep)
    return pl.pallas_call(
        kernel,
        out_shape=jax.ShapeDtypeStruct((B, Sq, Ep), x_p.dtype),
        grid_spec=pltpu.PrefetchScalarGridSpec(
            num_scalar_prefetch=0,
            grid=(B, nq, nk),
            in_specs=[
                pl.BlockSpec((1, tile_q, Ep), lambda b, qi, kk: (b, qi, 0)),
                pl.BlockSpec((Ep, Ep), lambda b, qi, kk: (0, 0)),
                pl.BlockSpec((1, Ep), lambda b, qi, kk: (0, 0)),
                pl.BlockSpec((1, tile_k, two_ep), lambda b, qi, kk: (b, kk, 0)),
            ],
            out_specs=pl.BlockSpec((1, tile_q, Ep), lambda b, qi, kk: (b, qi, 0)),
            scratch_shapes=[
                pltpu.VMEM((tile_q, Ep), x_p.dtype),     # scaled Q (resident)
                pltpu.VMEM((tile_q, 1), jnp.float32),    # running max
                pltpu.VMEM((tile_q, 1), jnp.float32),    # running denom
                pltpu.VMEM((tile_q, Ep), jnp.float32),   # output accumulator
            ],
        ),
        compiler_params=pltpu.CompilerParams(
            dimension_semantics=("parallel", "parallel", "arbitrary"),
            vmem_limit_bytes=48 * 1024 * 1024),
        cost_estimate=pl.CostEstimate(
            flops=2 * B * Sq * Ep * Ep + 4 * B * Sq * Sk * Ep,
            transcendentals=B * Sq * Sk,
            bytes_accessed=(B * Sq * Ep + Ep * Ep + Ep
                            + B * nq * Sk * two_ep + B * Sq * Ep) * itemsize),
    )(x_p, wq_t, bq_p, kv)


# ------------------------------- wrapper ------------------------------------

def cross_attention(x, enc_output, wq, bq, wk, bk, wv, bv):
    """x: (B, Sq, E), enc_output: (B, Sk, E). Weights are PyTorch-style (out, in)."""
    B, Sq, E = x.shape
    _, Sk, _ = enc_output.shape
    inv_scale = 1.0 / math.sqrt(E)           # scale uses the *real* embed dim
    Ep = _round_up(E, 128)                   # lane-dense padding

    def prep_w(w):                           # (out,in) -> padded (Ep, Ep), y = x @ w_t
        return jnp.pad(w.T, ((0, Ep - E), (0, Ep - E)))

    def prep_b(b):
        return jnp.pad(b, (0, Ep - E)).reshape(1, Ep)

    wq_t = prep_w(wq)
    bq_p = prep_b(bq)
    wkv_t = jnp.concatenate([prep_w(wk), prep_w(wv)], axis=1)    # (Ep, 2Ep)
    bkv_p = jnp.concatenate([prep_b(bk), prep_b(bv)], axis=1)    # (1, 2Ep)

    x_p = jnp.pad(x, ((0, 0), (0, 0), (0, Ep - E)))
    enc_p = jnp.pad(enc_output, ((0, 0), (0, 0), (0, Ep - E)))

    # Fused K/V projection with batch folded into the matmul M dimension.
    kv_flat = _linear(enc_p.reshape(B * Sk, Ep), wkv_t, bkv_p)   # (B*Sk, 2Ep)
    kv = kv_flat.reshape(B, Sk, 2 * Ep)

    # Q projection fused into the flash-attention kernel.
    out_p = _fused_attention(x_p, kv, wq_t, bq_p, inv_scale)     # (B, Sq, Ep)
    return out_p[:, :, :E]


# ------------------------------ reference -----------------------------------

def cross_attention_ref(x, enc_output, wq, bq, wk, bk, wv, bv):
    E = x.shape[-1]
    q = x @ wq.T + bq
    k = enc_output @ wk.T + bk
    v = enc_output @ wv.T + bv
    attn = jnp.einsum("bqe,bke->bqk", q, k) / math.sqrt(E)
    attn = jax.nn.softmax(attn, axis=-1)
    return jnp.einsum("bqk,bke->bqe", attn, v)


if __name__ == "__main__":
    B, Sq, Sk, E = 2, 8, 8, 32   # embed_dim = 32

    key = jax.random.PRNGKey(0)
    kx, ke, k1, k2, k3, k4, k5, k6 = jax.random.split(key, 8)

    x = jax.random.normal(kx, (B, Sq, E), dtype=jnp.float32)
    enc = jax.random.normal(ke, (B, Sk, E), dtype=jnp.float32)

    bound = 1.0 / math.sqrt(E)
    wq = jax.random.uniform(k1, (E, E), minval=-bound, maxval=bound, dtype=jnp.float32)
    bq = jax.random.uniform(k2, (E,), minval=-bound, maxval=bound, dtype=jnp.float32)
    wk = jax.random.uniform(k3, (E, E), minval=-bound, maxval=bound, dtype=jnp.float32)
    bk = jax.random.uniform(k4, (E,), minval=-bound, maxval=bound, dtype=jnp.float32)
    wv = jax.random.uniform(k5, (E, E), minval=-bound, maxval=bound, dtype=jnp.float32)
    bv = jax.random.uniform(k6, (E,), minval=-bound, maxval=bound, dtype=jnp.float32)

    out = cross_attention(x, enc, wq, bq, wk, bk, wv, bv)
    out = jax.block_until_ready(out)

    ref = cross_attention_ref(x, enc, wq, bq, wk, bk, wv, bv)
    assert out.shape == (B, Sq, E)
    # Tolerance accounts for the EUP approximate reciprocal in the softmax epilogue.
    assert jnp.allclose(out, ref, atol=2e-3, rtol=2e-3), "mismatch vs reference"

    print("KERNEL_OK")
</pallas_src>

<mosaic_0001>
module attributes {stable_mosaic.version = 11 : i64} {
  func.func @_linear_kernel(%arg0: i32, %arg1: i32, %arg2: memref<16x128xf32, #tpu.memory_space<vmem>>, %arg3: memref<128x256xf32, #tpu.memory_space<vmem>>, %arg4: memref<1x256xf32, #tpu.memory_space<vmem>>, %arg5: memref<16x256xf32, #tpu.memory_space<vmem>>) attributes {dimension_semantics = [#tpu.dimension_semantics<parallel>, #tpu.dimension_semantics<parallel>], iteration_bounds = array<i64: 1, 1>, scalar_prefetch = 0 : i64, scratch_operands = 0 : i64, tpu.core_type = #tpu.core_type<tc>, window_params = [{transform_indices = @transform_0, window_bounds = array<i64: 16, 128>}, {transform_indices = @transform_1, window_bounds = array<i64: 128, 256>}, {transform_indices = @transform_2, window_bounds = array<i64: 1, 256>}, {transform_indices = @transform_3, window_bounds = array<i64: 16, 256>}]} {
    %c0 = arith.constant 0 : index
    %c0_0 = arith.constant 0 : index
    %0 = vector.load %arg2[%c0, %c0_0] : memref<16x128xf32, #tpu.memory_space<vmem>>, vector<16x128xf32>
    %c0_1 = arith.constant 0 : index
    %c0_2 = arith.constant 0 : index
    %1 = vector.load %arg3[%c0_1, %c0_2] : memref<128x256xf32, #tpu.memory_space<vmem>>, vector<128x256xf32>
    %cst = arith.constant dense<0.000000e+00> : vector<16x256xf32>
    %2 = tpu.matmul %0, %1, %cst {dimension_numbers = #tpu.dot_dimension_numbers<[1], [0], [0], [1], [0, 0, 1, 1], [], []>} : vector<16x128xf32>, vector<128x256xf32>, vector<16x256xf32> -> vector<16x256xf32>
    %c0_3 = arith.constant 0 : index
    %c0_4 = arith.constant 0 : index
    %3 = vector.load %arg4[%c0_3, %c0_4] : memref<1x256xf32, #tpu.memory_space<vmem>>, vector<1x256xf32>
    %4 = vector.broadcast %3 : vector<1x256xf32> to vector<16x256xf32>
    %5 = arith.addf %2, %4 : vector<16x256xf32>
    %c0_5 = arith.constant 0 : index
    %c0_6 = arith.constant 0 : index
    %6 = vector.load %arg5[%c0_5, %c0_6] : memref<16x256xf32, #tpu.memory_space<vmem>>, vector<16x256xf32>
    tpu.vector_store %arg5[%c0_5, %c0_6], %5 {strides = array<i32>} : memref<16x256xf32, #tpu.memory_space<vmem>>, vector<16x256xf32>,
    return
  }
  func.func @transform_0(%arg0: i32, %arg1: i32) -> (i32, i32) {
    %c0_i32 = arith.constant 0 : i32
    %c0_i32_0 = arith.constant 0 : i32
    return %arg0, %c0_i32 : i32, i32
  }
  func.func @transform_1(%arg0: i32, %arg1: i32) -> (i32, i32) {
    %c0_i32 = arith.constant 0 : i32
    %c0_i32_0 = arith.constant 0 : i32
    return %c0_i32, %arg1 : i32, i32
  }
  func.func @transform_2(%arg0: i32, %arg1: i32) -> (i32, i32) {
    %c0_i32 = arith.constant 0 : i32
    %c0_i32_0 = arith.constant 0 : i32
    return %c0_i32, %arg1 : i32, i32
  }
  func.func @transform_3(%arg0: i32, %arg1: i32) -> (i32, i32) {
    %c0_i32 = arith.constant 0 : i32
    return %arg0, %arg1 : i32, i32
  }
}

</mosaic_0001>

<bundles_post_ra>
// kernel: tpu_custom_call.1
= control target key start
LH: loop header
LB: loop body
LE: loop exit
PB: predicated region body
PF: predicated region fallthrough
CT: control target
= control target key end

     0   :  { %8 = vsyncpa [#allocation3], 0  ;;  %s389_s0 = inlined_call_operand.hbm [shape: f32[16,128], index: 0, kind: input, shape index: {}]   ;;  %s390_s1 = inlined_call_operand.hbm [shape: f32[128,256], index: 1, kind: input, shape index: {}]   ;;  %s391_s2 = inlined_call_operand.vmem [shape: f32[1,256], index: 2, kind: input, shape index: {}]   ;;  %s392_s3 = inlined_call_operand.hbm [shape: f32[16,256], index: 3, kind: output, shape index: {}]  }
   0x1   :  { %9 = vsyncpa [#allocation6], 0 }
   0x2   :  { %10 = vsyncpa [#allocation4], 0  ;;  %s316_s12 = smov [#allocation2]   ;;  %s244_s16 = scalar_lea.hbm %s389_s0, 256 }
   0x3   :  { %s16_s13 = sshll.u32 %s316_s12, 4  ;;  %p245_p0 = scmp.ne.s32.totalorder %s389_s0, %s244_s16  ;;  %s17_s13 = int_to_ptr.vmem [resolvable:$true] %s16_s13 }
   0x4   :  { %p248_p1 = scmp.lt.u32.totalorder %s244_s16, %s389_s0 }
   0x6   :  { %p250_p2 = pnand %p248_p1, %p245_p0 }
   0x8   :  { %253 = shalt.err (!%p250_p2)
}
   0x9   :  { %s254_s21 = scalar_lea.vmem %s17_s13, 256  ;;  %p259_p4 = scmp.lt.s32.totalorder %s17_s13, %s17_s13 }
   0xa   :  { %p255_p3 = scmp.ne.s32.totalorder %s17_s13, %s254_s21  ;;  %p260_p5 = scmp.lt.s32.totalorder %s254_s21, %s254_s21 }
   0xc   :  { %p261_p6 = por %p260_p5, %p259_p4 }
   0xe   :  { %p262_p7 = pnand %p261_p6, %p255_p3 }
  0x10   :  { %265 = shalt.err (!%p262_p7)
}
  0x11   :  { %s317_s22 = smov 128   ;;  %s318_s23 = smov 8  }
  0x12   :  { %22 = dma.hbm_to_vmem [thread:$0]  %s389_s0, 256, %s17_s13, [#allocation3], %s317_s22, %s317_s22, %s318_s23  }
  0x13   :  { %s319_s26 = smov [#allocation5]   ;;  %s266_s30 = scalar_lea.hbm %s390_s1, 4096 }
  0x14   :  { %s28_s27 = sshll.u32 %s319_s26, 4  ;;  %p267_p8 = scmp.ne.s32.totalorder %s390_s1, %s266_s30  ;;  %s29_s27 = int_to_ptr.vmem [resolvable:$true] %s28_s27 }
  0x15   :  { %p270_p9 = scmp.lt.u32.totalorder %s266_s30, %s390_s1 }
  0x17   :  { %p272_p10 = pnand %p270_p9, %p267_p8 }
  0x19   :  { %275 = shalt.err (!%p272_p10)
}
  0x1a   :  { %s276_s8 = scalar_lea.vmem %s29_s27, 4096  ;;  %p281_p12 = scmp.lt.s32.totalorder %s29_s27, %s29_s27 }
  0x1b   :  { %p277_p11 = scmp.ne.s32.totalorder %s29_s27, %s276_s8  ;;  %p282_p13 = scmp.lt.s32.totalorder %s276_s8, %s276_s8 }
  0x1d   :  { %p283_p0 = por %p282_p13, %p281_p12 }
  0x1f   :  { %p284_p1 = pnand %p283_p0, %p277_p11 }
  0x21   :  { %287 = shalt.err (!%p284_p1)
}
  0x22   :  { %s320_s0 = smov 256   ;;  %s321_s9 = smov 16  }
  0x23   :  { %34 = dma.hbm_to_vmem [thread:$0]  %s390_s1, 4096, %s29_s27, [#allocation6], %s320_s0, %s320_s0, %s321_s9  }
  0x24   :  { %310 = dma.done.wait [#allocation3], 256  }
  0x25   :  { %311 = vsyncadd [#allocation3], 4294967040 }
  0x26   :  { %312 = dma.done.wait [#allocation6], 4096  }
  0x27   :  { %313 = vsyncadd [#allocation6], 4294963200  ;;  %v322_v0 = vmov 0.0   ;;  %v46_v1 = vld [vmem:[#allocation5 + $0x8] sm:$0xff]  ;;  %v48_v2 = vld [vmem:[#allocation5 + $0x18] sm:$0xff]  ;;  %v79_v51 = vlaneseq  ;;  %s323_s13 = smov [#allocation7]  }
  0x28   :  { %153 = vmatprep.mubr.f32.mxu0 %v322_v0  ;;  %159 = vmatprep.mubr.f32.mxu1 %v322_v0  ;;  %v45_v3 = vld [vmem:[#allocation5] sm:$0xff]  ;;  %v188_v4 = vpack.c.bf16 %v48_v2, %v46_v1  ;;  %v47_v5 = vld [vmem:[#allocation5 + $0x10] sm:$0xff]  ;;  %v50_v6 = vld [vmem:[#allocation5 + $0x28] sm:$0xff]  ;;  %s175_s14 = sshll.u32 %s323_s13, 4  ;;  %s176_s14 = int_to_ptr.vmem [resolvable:$true] %s175_s14 }
  0x29   :  { %v52_v7 = vld [vmem:[#allocation5 + $0x38] sm:$0xff]  ;;  %v190_v8 = vpack.c.bf16 %v47_v5, %v45_v3  ;;  %v49_v10 = vld [vmem:[#allocation5 + $0x20] sm:$0xff]  ;;  %v51_v11 = vld [vmem:[#allocation5 + $0x30] sm:$0xff]  ;;  %v80_v52 = vshrl.u32 %v79_v51, 7  ;;  %s288_s15 = scalar_lea.vmem %s176_s14, 512  ;;  %p293_p3 = scmp.lt.s32.totalorder %s176_s14, %s176_s14 }
  0x2a   :  { %v192_v9 = vpack.c.bf16 %v52_v7, %v50_v6  ;;  %v54_v12 = vld [vmem:[#allocation5 + $0x48] sm:$0xff]  ;;  %189 = vmatprep.subr.bf16.mxu0 %v188_v4  ;;  %220 = vmatprep.subr.bf16.mxu1 %v188_v4  ;;  %v56_v13 = vld [vmem:[#allocation5 + $0x58] sm:$0xff]  ;;  %v194_v14 = vpack.c.bf16 %v51_v11, %v49_v10  ;;  %v53_v16 = vld [vmem:[#allocation5 + $0x40] sm:$0xff]  ;;  %p289_p2 = scmp.ne.s32.totalorder %s176_s14, %s288_s15  ;;  %p294_p4 = scmp.lt.s32.totalorder %s288_s15, %s288_s15 }
  0x2b   :  { %191 = vmatpush1.bf16.msra.mxu0 %v190_v8  ;;  %228 = vmatpush1.bf16.msra.mxu1 %v190_v8  ;;  %v196_v15 = vpack.c.bf16 %v56_v13, %v54_v12  ;;  %v55_v17 = vld [vmem:[#allocation5 + $0x50] sm:$0xff]  ;;  %v58_v18 = vld [vmem:[#allocation5 + $0x68] sm:$0xff]  ;;  %v60_v19 = vld [vmem:[#allocation5 + $0x78] sm:$0xff]  ;;  %v81_v53 = vsub.s32 0, %v80_v52  ;;  %v85_v55 = vsub.s32 1, %v80_v52 }
  0x2c   :  { %193 = vmatprep.subr.bf16.mxu0 %v192_v9  ;;  %221 = vmatprep.subr.bf16.mxu1 %v192_v9  ;;  %v198_v20 = vpack.c.bf16 %v55_v17, %v53_v16  ;;  %v200_v21 = vpack.c.bf16 %v60_v19, %v58_v18  ;;  %v57_v22 = vld [vmem:[#allocation5 + $0x60] sm:$0xff]  ;;  %v59_v23 = vld [vmem:[#allocation5 + $0x70] sm:$0xff]  ;;  %v62_v24 = vld [vmem:[#allocation5 + $0x88] sm:$0xff]  ;;  %p295_p5 = por %p294_p4, %p293_p3 }
  0x2d   :  { %v64_v25 = vld [vmem:[#allocation5 + $0x98] sm:$0xff]  ;;  %v202_v26 = vpack.c.bf16 %v59_v23, %v57_v22  ;;  %v61_v28 = vld [vmem:[#allocation5 + $0x80] sm:$0xff]  ;;  %v63_v29 = vld [vmem:[#allocation5 + $0x90] sm:$0xff] }
  0x2e   :  { %v204_v27 = vpack.c.bf16 %v64_v25, %v62_v24  ;;  %v66_v30 = vld [vmem:[#allocation5 + $0xa8] sm:$0xff]  ;;  %v68_v31 = vld [vmem:[#allocation5 + $0xb8] sm:$0xff]  ;;  %v206_v32 = vpack.c.bf16 %v63_v29, %v61_v28  ;;  %v65_v34 = vld [vmem:[#allocation5 + $0xa0] sm:$0xff]  ;;  %p296_p6 = pnand %p295_p5, %p289_p2 }
  0x2f   :  { %195 = vmatpush1.bf16.msra.mxu0 %v194_v14  ;;  %229 = vmatpush1.bf16.msra.mxu1 %v194_v14  ;;  %v208_v33 = vpack.c.bf16 %v68_v31, %v66_v30  ;;  %v67_v35 = vld [vmem:[#allocation5 + $0xb0] sm:$0xff]  ;;  %v70_v36 = vld [vmem:[#allocation5 + $0xc8] sm:$0xff]  ;;  %v72_v37 = vld [vmem:[#allocation5 + $0xd8] sm:$0xff] }
  0x30   :  { %197 = vmatprep.subr.bf16.mxu0 %v196_v15  ;;  %222 = vmatprep.subr.bf16.mxu1 %v196_v15  ;;  %v210_v38 = vpack.c.bf16 %v67_v35, %v65_v34  ;;  %v212_v39 = vpack.c.bf16 %v72_v37, %v70_v36  ;;  %v69_v40 = vld [vmem:[#allocation5 + $0xc0] sm:$0xff]  ;;  %v71_v41 = vld [vmem:[#allocation5 + $0xd0] sm:$0xff]  ;;  %v74_v42 = vld [vmem:[#allocation5 + $0xe8] sm:$0xff] }
  0x31   :  { %v76_v43 = vld [vmem:[#allocation5 + $0xf8] sm:$0xff]  ;;  %v214_v44 = vpack.c.bf16 %v71_v41, %v69_v40  ;;  %v73_v46 = vld [vmem:[#allocation5 + $0xe0] sm:$0xff]  ;;  %v75_v47 = vld [vmem:[#allocation5 + $0xf0] sm:$0xff] }
  0x32   :  { %v216_v45 = vpack.c.bf16 %v76_v43, %v74_v42  ;;  %v218_v48 = vpack.c.bf16 %v75_v47, %v73_v46  ;;  %v43_v49 = vld [vmem:[#allocation2] sm:$0xff]  ;;  %v44_v50 = vld [vmem:[#allocation2 + $0x8] sm:$0xff] }
  0x33   :  { %199 = vmatpush1.bf16.msra.mxu0 %v198_v20  ;;  %230 = vmatpush1.bf16.msra.mxu1 %v198_v20  ;;  %v77_v54 = vld [vmem:[%s391_s2] sm:$0x3] }
  0x34   :  { %201 = vmatprep.subr.bf16.mxu0 %v200_v21  ;;  %223 = vmatprep.subr.bf16.mxu1 %v200_v21  ;;  %v82_v56 = vrot.slane %v77_v54, %v81_v53  ;;  %v86_v57 = vrot.slane %v77_v54, %v85_v55 }
  0x37   :  { %203 = vmatpush1.bf16.msra.mxu0 %v202_v26  ;;  %231 = vmatpush1.bf16.msra.mxu1 %v202_v26 }
  0x38   :  { %205 = vmatprep.subr.bf16.mxu0 %v204_v27  ;;  %224 = vmatprep.subr.bf16.mxu1 %v204_v27 }
  0x3b   :  { %207 = vmatpush1.bf16.msra.mxu0 %v206_v32  ;;  %232 = vmatpush1.bf16.msra.mxu1 %v206_v32 }
  0x3c   :  { %209 = vmatprep.subr.bf16.mxu0 %v208_v33  ;;  %225 = vmatprep.subr.bf16.mxu1 %v208_v33 }
  0x3f   :  { %211 = vmatpush1.bf16.msra.mxu0 %v210_v38  ;;  %233 = vmatpush1.bf16.msra.mxu1 %v210_v38 }
  0x40   :  { %213 = vmatprep.subr.bf16.mxu0 %v212_v39  ;;  %226 = vmatprep.subr.bf16.mxu1 %v212_v39 }
  0x43   :  { %215 = vmatpush1.bf16.msra.mxu0 %v214_v44  ;;  %234 = vmatpush1.bf16.msra.mxu1 %v214_v44 }
  0x44   :  { %217 = vmatprep.subr.bf16.mxu0 %v216_v45  ;;  %227 = vmatprep.subr.bf16.mxu1 %v216_v45 }
  0x47   :  { %219 = vmatpush1.bf16.msra.mxu0 %v218_v48  ;;  %235 = vmatpush1.bf16.msra.mxu1 %v218_v48 }
  0x4a   :  { %154 = vmatmul.mubr.f32.vlgmr.msra.gmra.mrb[0].mxu0 %v43_v49  ;;  %160 = vmatmul.mubr.f32.vlgmr.msra.gmra.mrb[0].mxu1 %v44_v50 }
 0x11d   :  { %v155_v58 = vpop.f32.mrb[0].mxu0  ;;  %v161_v59 = vpop.f32.mrb[0].mxu1 }
 0x11e   :  { %v156_v60 = vadd.f32 %v155_v58, %v82_v56  ;;  %v162_v61 = vadd.f32 %v161_v59, %v82_v56  ;;  %v157_v62 = vpop.f32.mrb[1].mxu0  ;;  %v163_v63 = vpop.f32.mrb[1].mxu1 }
 0x11f   :  { %v158_v0 = vadd.f32 %v157_v62, %v86_v57  ;;  %v164_v1 = vadd.f32 %v163_v63, %v86_v57 }
 0x120   :  { %166 = vst [vmem:[#allocation7] sm:$0xff] %v156_v60  ;;  %168 = vst [vmem:[#allocation7 + $0x10] sm:$0xff] %v162_v61 }
 0x121   :  { %167 = vst [vmem:[#allocation7 + $0x8] sm:$0xff] %v158_v0  ;;  %169 = vst [vmem:[#allocation7 + $0x18] sm:$0xff] %v164_v1 }
 0x122   :  { %299 = shalt.err (!%p296_p6)
}
 0x123   :  { %s300_s17 = scalar_lea.hbm %s392_s3, 512 }
 0x124   :  { %p301_p7 = scmp.ne.s32.totalorder %s392_s3, %s300_s17  ;;  %p304_p8 = scmp.lt.u32.totalorder %s300_s17, %s392_s3 }
 0x126   :  { %p306_p9 = pnand %p304_p8, %p301_p7 }
 0x128   :  { %309 = shalt.err (!%p306_p9)
}
 0x129   :  { %181 = dma.vmem_to_hbm [thread:$0]  %s176_s14, 512, %s392_s3, [#allocation4], %s320_s0, %s320_s0, %s321_s9  }
 0x12a   :  { %314 = dma.done.wait [#allocation4], 512  }
 0x12b   :  { %315 = vsyncadd [#allocation4], 4294966784 }
 0x12c   :  { %185 = vsyncpa [#allocation3], 1 }
 0x12d   :  { %186 = vsyncpa [#allocation6], 1 }
 0x12e   :  { %187 = vsyncpa [#allocation4], 1 }

</bundles_post_ra>
